<compile_context>
chip_gen: v5e
topology: v5e:2x2
jax: 0.10.0
libtpu: 0.0.40
codegen_flags: <defaults>
</compile_context>

<pallas_src>
import jax
import jax.numpy as jnp
from jax import lax
from jax.experimental import pallas as pl
from jax.experimental.pallas import tpu as pltpu


def _make_moments_kernel(hw, hw_tile, mask_tail):
    """Kernel computing per-row (B*C) spatial moments in one streaming pass."""
    inv_n = 1.0 / float(hw)
    n = float(hw)

    def kernel(x_ref, y_ref, out_ref, sx, sy, sxy, sxx, syy, mnx, mny):
        k = pl.program_id(1)

        @pl.when(k == 0)
        def _init():
            zero = jnp.zeros_like(sx)
            sx[...] = zero
            sy[...] = zero
            sxy[...] = zero
            sxx[...] = zero
            syy[...] = zero
            mnx[...] = jnp.full_like(mnx, jnp.inf)
            mny[...] = jnp.full_like(mny, jnp.inf)

        x = x_ref[...].astype(jnp.float32)
        y = y_ref[...].astype(jnp.float32)

        if mask_tail:
            # Last H*W block may run past the array; mask invalid lanes.
            lane = lax.broadcasted_iota(jnp.int32, x.shape, 1)
            valid = (k * hw_tile + lane) < hw
            xs = jnp.where(valid, x, 0.0)
            ys = jnp.where(valid, y, 0.0)
            xm = jnp.where(valid, x, jnp.inf)
            ym = jnp.where(valid, y, jnp.inf)
        else:
            xs, ys, xm, ym = x, y, x, y

        sx[...] += jnp.sum(xs, axis=1, keepdims=True)
        sy[...] += jnp.sum(ys, axis=1, keepdims=True)
        sxy[...] += jnp.sum(xs * ys, axis=1, keepdims=True)
        sxx[...] += jnp.sum(xs * xs, axis=1, keepdims=True)
        syy[...] += jnp.sum(ys * ys, axis=1, keepdims=True)
        mnx[...] = jnp.minimum(mnx[...], jnp.min(xm, axis=1, keepdims=True))
        mny[...] = jnp.minimum(mny[...], jnp.min(ym, axis=1, keepdims=True))

        @pl.when(k == pl.num_programs(1) - 1)
        def _finalize():
            # mx = |min(x)|, my = |min(y)|  (PyTorch .detach(): no grads flow
            # through pallas_call anyway, so forward value is identical).
            mx = jnp.abs(mnx[...])
            my = jnp.abs(mny[...])
            s_x = sx[...]
            s_y = sy[...]
            # Centered moments via algebraic expansion of (x - mx), (y - my).
            prod = (sxy[...] - my * s_x - mx * s_y + n * mx * my) * inv_n
            xvar = (sxx[...] - 2.0 * mx * s_x + n * mx * mx) * inv_n
            yvar = (syy[...] - 2.0 * my * s_y + n * my * my) * inv_n
            xabs = jnp.sqrt(jnp.maximum(xvar, 0.0))
            yabs = jnp.sqrt(jnp.maximum(yvar, 0.0))
            # Pack the three per-row results into a lane-dense (rows, 128) block.
            lane = lax.broadcasted_iota(jnp.int32, out_ref.shape, 1)
            out_ref[...] = (jnp.where(lane == 0, prod, 0.0)
                            + jnp.where(lane == 1, xabs, 0.0)
                            + jnp.where(lane == 2, yabs, 0.0))

    return kernel


def _patch_moments(x, y):
    """Pallas hot path: per-(B,C) spatial reductions. Returns (B,C) arrays."""
    B, C, H, W = x.shape
    BC, HW = B * C, H * W
    xf = x.reshape(BC, HW)   # view-like reshape; no extra HBM pass
    yf = y.reshape(BC, HW)

    itemsize = jnp.dtype(x.dtype).itemsize

    # Tile selection: keep 2 inputs x 2 pipeline buffers x tile_bytes well
    # under the scoped VMEM limit on every generation (incl. v7x's 64 MiB).
    rows_tile = BC if BC <= 256 else 256            # full-extent or mult. of 8
    budget_elems = max((4 * 1024 * 1024) // itemsize, rows_tile * 128)
    max_hw = max(128, (budget_elems // rows_tile) // 128 * 128)
    hw_tile = HW if HW <= max_hw else max_hw        # full-extent or mult. of 128

    n_rows = pl.cdiv(BC, rows_tile)
    n_hw = pl.cdiv(HW, hw_tile)
    mask_tail = (HW % hw_tile) != 0
    r_out = n_rows * rows_tile

    kernel = _make_moments_kernel(HW, hw_tile, mask_tail)

    moments = pl.pallas_call(
        kernel,
        out_shape=jax.ShapeDtypeStruct((r_out, 128), jnp.float32),
        grid_spec=pltpu.PrefetchScalarGridSpec(
            num_scalar_prefetch=0,
            grid=(n_rows, n_hw),
            in_specs=[
                pl.BlockSpec((rows_tile, hw_tile), lambda i, k: (i, k)),
                pl.BlockSpec((rows_tile, hw_tile), lambda i, k: (i, k)),
            ],
            out_specs=pl.BlockSpec((rows_tile, 128), lambda i, k: (i, 0)),
            scratch_shapes=[pltpu.VMEM((rows_tile, 1), jnp.float32)
                            for _ in range(7)],
        ),
        compiler_params=pltpu.CompilerParams(
            dimension_semantics=("parallel", "arbitrary"),
            vmem_limit_bytes=32 << 20,
        ),
        cost_estimate=pl.CostEstimate(
            flops=10 * BC * HW,
            transcendentals=0,
            bytes_accessed=2 * BC * HW * itemsize + r_out * 128 * 4,
        ),
    )(xf, yf)

    prod = moments[:BC, 0].reshape(B, C)   # mean((x-mx)*(y-my)) per (b,c)
    xabs = moments[:BC, 1].reshape(B, C)   # rms(x-mx) per (b,c)
    yabs = moments[:BC, 2].reshape(B, C)   # rms(y-my) per (b,c)
    return prod, xabs, yabs


def gradient_consistency_loss_patch(x, y):
    eps = 1e-5
    prod, xabs, yabs = _patch_moments(x, y)

    # loss1: per-(B,C) cosine-style terms, mean over all (B,C).
    r1 = prod / (xabs * yabs + eps)
    # Clip only inside arccos: guards the float-error |r|>1 case where the
    # PyTorch original would produce NaN; otherwise identical.
    loss1 = jnp.mean(1.0 - r1) + jnp.mean(jnp.arccos(jnp.clip(r1, -1.0, 1.0)))

    # loss2: combine over the channel axis, mean over B.
    prod_c = jnp.mean(prod, axis=1)                  # (B,)
    xabs2 = jnp.sqrt(jnp.mean(xabs ** 2, axis=1))    # (B,)
    yabs2 = jnp.sqrt(jnp.mean(yabs ** 2, axis=1))    # (B,)
    r2 = prod_c / (xabs2 * yabs2 + eps)
    loss2 = jnp.mean(1.0 - r2) + jnp.mean(jnp.arccos(jnp.clip(r2, -1.0, 1.0)))

    return loss1 + loss2


@jax.jit
def l_bright_cosist(x, y):
    # PyTorch forward computes quadrant losses into a local `loss1` but
    # returns only the full-image `loss`, so only that term is needed.
    return gradient_consistency_loss_patch(x, y)


if __name__ == "__main__":
    key = jax.random.PRNGKey(0)
    kx, ky = jax.random.split(key)
    B, C, H, W = 2, 4, 16, 16
    x = jax.random.uniform(kx, (B, C, H, W), dtype=jnp.float32)
    y = jax.random.uniform(ky, (B, C, H, W), dtype=jnp.float32)

    out = l_bright_cosist(x, y)
    jax.block_until_ready(out)
    assert out.shape == () and bool(jnp.isfinite(out))
    print("KERNEL_OK")
</pallas_src>

<mosaic_0001>
module attributes {stable_mosaic.version = 11 : i64} {
  func.func @kernel(%arg0: i32, %arg1: i32, %arg2: memref<8x256xf32, #tpu.memory_space<vmem>>, %arg3: memref<8x256xf32, #tpu.memory_space<vmem>>, %arg4: memref<8x128xf32, #tpu.memory_space<vmem>>, %arg5: memref<8x1xf32, #tpu.memory_space<vmem>>, %arg6: memref<8x1xf32, #tpu.memory_space<vmem>>, %arg7: memref<8x1xf32, #tpu.memory_space<vmem>>, %arg8: memref<8x1xf32, #tpu.memory_space<vmem>>, %arg9: memref<8x1xf32, #tpu.memory_space<vmem>>, %arg10: memref<8x1xf32, #tpu.memory_space<vmem>>, %arg11: memref<8x1xf32, #tpu.memory_space<vmem>>) attributes {dimension_semantics = [#tpu.dimension_semantics<parallel>, #tpu.dimension_semantics<arbitrary>], iteration_bounds = array<i64: 1, 1>, scalar_prefetch = 0 : i64, scratch_operands = 7 : i64, tpu.core_type = #tpu.core_type<tc>, window_params = [{transform_indices = @transform_0, window_bounds = array<i64: 8, 256>}, {transform_indices = @transform_1, window_bounds = array<i64: 8, 256>}, {transform_indices = @transform_2, window_bounds = array<i64: 8, 128>}]} {
    %c0_i32 = arith.constant 0 : i32
    %0 = arith.cmpi eq, %arg1, %c0_i32 : i32
    %1 = arith.extui %0 : i1 to i32
    %c0_i32_0 = arith.constant 0 : i32
    %2 = arith.cmpi ne, %1, %c0_i32_0 : i32
    scf.if %2 {
      %cst_40 = arith.constant 0.000000e+00 : f32
      %46 = vector.broadcast %cst_40 : f32 to vector<8x1xf32>
      %c0_41 = arith.constant 0 : index
      %c0_42 = arith.constant 0 : index
      %47 = vector.load %arg5[%c0_41, %c0_42] : memref<8x1xf32, #tpu.memory_space<vmem>>, vector<8x1xf32>
      tpu.vector_store %arg5[%c0_41, %c0_42], %46 {strides = array<i32>} : memref<8x1xf32, #tpu.memory_space<vmem>>, vector<8x1xf32>,
      %c0_43 = arith.constant 0 : index
      %c0_44 = arith.constant 0 : index
      %48 = vector.load %arg6[%c0_43, %c0_44] : memref<8x1xf32, #tpu.memory_space<vmem>>, vector<8x1xf32>
      tpu.vector_store %arg6[%c0_43, %c0_44], %46 {strides = array<i32>} : memref<8x1xf32, #tpu.memory_space<vmem>>, vector<8x1xf32>,
      %c0_45 = arith.constant 0 : index
      %c0_46 = arith.constant 0 : index
      %49 = vector.load %arg7[%c0_45, %c0_46] : memref<8x1xf32, #tpu.memory_space<vmem>>, vector<8x1xf32>
      tpu.vector_store %arg7[%c0_45, %c0_46], %46 {strides = array<i32>} : memref<8x1xf32, #tpu.memory_space<vmem>>, vector<8x1xf32>,
      %c0_47 = arith.constant 0 : index
      %c0_48 = arith.constant 0 : index
      %50 = vector.load %arg8[%c0_47, %c0_48] : memref<8x1xf32, #tpu.memory_space<vmem>>, vector<8x1xf32>
      tpu.vector_store %arg8[%c0_47, %c0_48], %46 {strides = array<i32>} : memref<8x1xf32, #tpu.memory_space<vmem>>, vector<8x1xf32>,
      %c0_49 = arith.constant 0 : index
      %c0_50 = arith.constant 0 : index
      %51 = vector.load %arg9[%c0_49, %c0_50] : memref<8x1xf32, #tpu.memory_space<vmem>>, vector<8x1xf32>
      tpu.vector_store %arg9[%c0_49, %c0_50], %46 {strides = array<i32>} : memref<8x1xf32, #tpu.memory_space<vmem>>, vector<8x1xf32>,
      %cst_51 = arith.constant 0x7F800000 : f32
      %52 = vector.broadcast %cst_51 : f32 to vector<8x1xf32>
      %c0_52 = arith.constant 0 : index
      %c0_53 = arith.constant 0 : index
      %53 = vector.load %arg10[%c0_52, %c0_53] : memref<8x1xf32, #tpu.memory_space<vmem>>, vector<8x1xf32>
      tpu.vector_store %arg10[%c0_52, %c0_53], %52 {strides = array<i32>} : memref<8x1xf32, #tpu.memory_space<vmem>>, vector<8x1xf32>,
      %cst_54 = arith.constant 0x7F800000 : f32
      %54 = vector.broadcast %cst_54 : f32 to vector<8x1xf32>
      %c0_55 = arith.constant 0 : index
      %c0_56 = arith.constant 0 : index
      %55 = vector.load %arg11[%c0_55, %c0_56] : memref<8x1xf32, #tpu.memory_space<vmem>>, vector<8x1xf32>
      tpu.vector_store %arg11[%c0_55, %c0_56], %54 {strides = array<i32>} : memref<8x1xf32, #tpu.memory_space<vmem>>, vector<8x1xf32>,
    } else {
    }
    %c0 = arith.constant 0 : index
    %c0_1 = arith.constant 0 : index
    %3 = vector.load %arg2[%c0, %c0_1] : memref<8x256xf32, #tpu.memory_space<vmem>>, vector<8x256xf32>
    %c0_2 = arith.constant 0 : index
    %c0_3 = arith.constant 0 : index
    %4 = vector.load %arg3[%c0_2, %c0_3] : memref<8x256xf32, #tpu.memory_space<vmem>>, vector<8x256xf32>
    %c0_4 = arith.constant 0 : index
    %c0_5 = arith.constant 0 : index
    %5 = vector.load %arg5[%c0_4, %c0_5] : memref<8x1xf32, #tpu.memory_space<vmem>>, vector<8x1xf32>
    %cst = arith.constant dense<0.000000e+00> : vector<8xf32>
    %6 = vector.multi_reduction <add>, %3, %cst [1] : vector<8x256xf32> to vector<8xf32>
    %7 = vector.shape_cast %6 : vector<8xf32> to vector<8x1xf32>
    %8 = arith.addf %5, %7 : vector<8x1xf32>
    %c0_6 = arith.constant 0 : index
    %c0_7 = arith.constant 0 : index
    %9 = vector.load %arg5[%c0_6, %c0_7] : memref<8x1xf32, #tpu.memory_space<vmem>>, vector<8x1xf32>
    tpu.vector_store %arg5[%c0_6, %c0_7], %8 {strides = array<i32>} : memref<8x1xf32, #tpu.memory_space<vmem>>, vector<8x1xf32>,
    %c0_8 = arith.constant 0 : index
    %c0_9 = arith.constant 0 : index
    %10 = vector.load %arg6[%c0_8, %c0_9] : memref<8x1xf32, #tpu.memory_space<vmem>>, vector<8x1xf32>
    %cst_10 = arith.constant dense<0.000000e+00> : vector<8xf32>
    %11 = vector.multi_reduction <add>, %4, %cst_10 [1] : vector<8x256xf32> to vector<8xf32>
    %12 = vector.shape_cast %11 : vector<8xf32> to vector<8x1xf32>
    %13 = arith.addf %10, %12 : vector<8x1xf32>
    %c0_11 = arith.constant 0 : index
    %c0_12 = arith.constant 0 : index
    %14 = vector.load %arg6[%c0_11, %c0_12] : memref<8x1xf32, #tpu.memory_space<vmem>>, vector<8x1xf32>
    tpu.vector_store %arg6[%c0_11, %c0_12], %13 {strides = array<i32>} : memref<8x1xf32, #tpu.memory_space<vmem>>, vector<8x1xf32>,
    %c0_13 = arith.constant 0 : index
    %c0_14 = arith.constant 0 : index
    %15 = vector.load %arg7[%c0_13, %c0_14] : memref<8x1xf32, #tpu.memory_space<vmem>>, vector<8x1xf32>
    %16 = arith.mulf %3, %4 : vector<8x256xf32>
    %cst_15 = arith.constant dense<0.000000e+00> : vector<8xf32>
    %17 = vector.multi_reduction <add>, %16, %cst_15 [1] : vector<8x256xf32> to vector<8xf32>
    %18 = vector.shape_cast %17 : vector<8xf32> to vector<8x1xf32>
    %19 = arith.addf %15, %18 : vector<8x1xf32>
    %c0_16 = arith.constant 0 : index
    %c0_17 = arith.constant 0 : index
    %20 = vector.load %arg7[%c0_16, %c0_17] : memref<8x1xf32, #tpu.memory_space<vmem>>, vector<8x1xf32>
    tpu.vector_store %arg7[%c0_16, %c0_17], %19 {strides = array<i32>} : memref<8x1xf32, #tpu.memory_space<vmem>>, vector<8x1xf32>,
    %c0_18 = arith.constant 0 : index
    %c0_19 = arith.constant 0 : index
    %21 = vector.load %arg8[%c0_18, %c0_19] : memref<8x1xf32, #tpu.memory_space<vmem>>, vector<8x1xf32>
    %22 = arith.mulf %3, %3 : vector<8x256xf32>
    %cst_20 = arith.constant dense<0.000000e+00> : vector<8xf32>
    %23 = vector.multi_reduction <add>, %22, %cst_20 [1] : vector<8x256xf32> to vector<8xf32>
    %24 = vector.shape_cast %23 : vector<8xf32> to vector<8x1xf32>
    %25 = arith.addf %21, %24 : vector<8x1xf32>
    %c0_21 = arith.constant 0 : index
    %c0_22 = arith.constant 0 : index
    %26 = vector.load %arg8[%c0_21, %c0_22] : memref<8x1xf32, #tpu.memory_space<vmem>>, vector<8x1xf32>
    tpu.vector_store %arg8[%c0_21, %c0_22], %25 {strides = array<i32>} : memref<8x1xf32, #tpu.memory_space<vmem>>, vector<8x1xf32>,
    %c0_23 = arith.constant 0 : index
    %c0_24 = arith.constant 0 : index
    %27 = vector.load %arg9[%c0_23, %c0_24] : memref<8x1xf32, #tpu.memory_space<vmem>>, vector<8x1xf32>
    %28 = arith.mulf %4, %4 : vector<8x256xf32>
    %cst_25 = arith.constant dense<0.000000e+00> : vector<8xf32>
    %29 = vector.multi_reduction <add>, %28, %cst_25 [1] : vector<8x256xf32> to vector<8xf32>
    %30 = vector.shape_cast %29 : vector<8xf32> to vector<8x1xf32>
    %31 = arith.addf %27, %30 : vector<8x1xf32>
    %c0_26 = arith.constant 0 : index
    %c0_27 = arith.constant 0 : index
    %32 = vector.load %arg9[%c0_26, %c0_27] : memref<8x1xf32, #tpu.memory_space<vmem>>, vector<8x1xf32>
    tpu.vector_store %arg9[%c0_26, %c0_27], %31 {strides = array<i32>} : memref<8x1xf32, #tpu.memory_space<vmem>>, vector<8x1xf32>,
    %c0_28 = arith.constant 0 : index
    %c0_29 = arith.constant 0 : index
    %33 = vector.load %arg10[%c0_28, %c0_29] : memref<8x1xf32, #tpu.memory_space<vmem>>, vector<8x1xf32>
    %cst_30 = arith.constant dense<0x7F800000> : vector<8xf32>
    %34 = vector.multi_reduction <minimumf>, %3, %cst_30 [1] : vector<8x256xf32> to vector<8xf32>
    %35 = vector.shape_cast %34 : vector<8xf32> to vector<8x1xf32>
    %36 = arith.minimumf %33, %35 : vector<8x1xf32>
    %c0_31 = arith.constant 0 : index
    %c0_32 = arith.constant 0 : index
    %37 = vector.load %arg10[%c0_31, %c0_32] : memref<8x1xf32, #tpu.memory_space<vmem>>, vector<8x1xf32>
    tpu.vector_store %arg10[%c0_31, %c0_32], %36 {strides = array<i32>} : memref<8x1xf32, #tpu.memory_space<vmem>>, vector<8x1xf32>,
    %c0_33 = arith.constant 0 : index
    %c0_34 = arith.constant 0 : index
    %38 = vector.load %arg11[%c0_33, %c0_34] : memref<8x1xf32, #tpu.memory_space<vmem>>, vector<8x1xf32>
    %cst_35 = arith.constant dense<0x7F800000> : vector<8xf32>
    %39 = vector.multi_reduction <minimumf>, %4, %cst_35 [1] : vector<8x256xf32> to vector<8xf32>
    %40 = vector.shape_cast %39 : vector<8xf32> to vector<8x1xf32>
    %41 = arith.minimumf %38, %40 : vector<8x1xf32>
    %c0_36 = arith.constant 0 : index
    %c0_37 = arith.constant 0 : index
    %42 = vector.load %arg11[%c0_36, %c0_37] : memref<8x1xf32, #tpu.memory_space<vmem>>, vector<8x1xf32>
    tpu.vector_store %arg11[%c0_36, %c0_37], %41 {strides = array<i32>} : memref<8x1xf32, #tpu.memory_space<vmem>>, vector<8x1xf32>,
    %c0_i32_38 = arith.constant 0 : i32
    %43 = arith.cmpi eq, %arg1, %c0_i32_38 : i32
    %44 = arith.extui %43 : i1 to i32
    %c0_i32_39 = arith.constant 0 : i32
    %45 = arith.cmpi ne, %44, %c0_i32_39 : i32
    scf.if %45 {
      %c0_40 = arith.constant 0 : index
      %c0_41 = arith.constant 0 : index
      %46 = vector.load %arg10[%c0_40, %c0_41] : memref<8x1xf32, #tpu.memory_space<vmem>>, vector<8x1xf32>
      %47 = math.absf %46 : vector<8x1xf32>
      %c0_42 = arith.constant 0 : index
      %c0_43 = arith.constant 0 : index
      %48 = vector.load %arg11[%c0_42, %c0_43] : memref<8x1xf32, #tpu.memory_space<vmem>>, vector<8x1xf32>
      %49 = math.absf %48 : vector<8x1xf32>
      %c0_44 = arith.constant 0 : index
      %c0_45 = arith.constant 0 : index
      %50 = vector.load %arg5[%c0_44, %c0_45] : memref<8x1xf32, #tpu.memory_space<vmem>>, vector<8x1xf32>
      %c0_46 = arith.constant 0 : index
      %c0_47 = arith.constant 0 : index
      %51 = vector.load %arg6[%c0_46, %c0_47] : memref<8x1xf32, #tpu.memory_space<vmem>>, vector<8x1xf32>
      %c0_48 = arith.constant 0 : index
      %c0_49 = arith.constant 0 : index
      %52 = vector.load %arg7[%c0_48, %c0_49] : memref<8x1xf32, #tpu.memory_space<vmem>>, vector<8x1xf32>
      %53 = arith.mulf %49, %50 : vector<8x1xf32>
      %54 = arith.subf %52, %53 : vector<8x1xf32>
      %55 = arith.mulf %47, %51 : vector<8x1xf32>
      %56 = arith.subf %54, %55 : vector<8x1xf32>
      %cst_50 = arith.constant 2.560000e+02 : f32
      %57 = vector.broadcast %cst_50 : f32 to vector<8x1xf32>
      %58 = arith.mulf %57, %47 : vector<8x1xf32>
      %59 = arith.mulf %58, %49 : vector<8x1xf32>
      %60 = arith.addf %56, %59 : vector<8x1xf32>
      %cst_51 = arith.constant 3.906250e-03 : f32
      %61 = vector.broadcast %cst_51 : f32 to vector<8x1xf32>
      %62 = arith.mulf %60, %61 : vector<8x1xf32>
      %c0_52 = arith.constant 0 : index
      %c0_53 = arith.constant 0 : index
      %63 = vector.load %arg8[%c0_52, %c0_53] : memref<8x1xf32, #tpu.memory_space<vmem>>, vector<8x1xf32>
      %cst_54 = arith.constant 2.000000e+00 : f32
      %64 = vector.broadcast %cst_54 : f32 to vector<8x1xf32>
      %65 = arith.mulf %64, %47 : vector<8x1xf32>
      %66 = arith.mulf %65, %50 : vector<8x1xf32>
      %67 = arith.subf %63, %66 : vector<8x1xf32>
      %cst_55 = arith.constant 2.560000e+02 : f32
      %68 = vector.broadcast %cst_55 : f32 to vector<8x1xf32>
      %69 = arith.mulf %68, %47 : vector<8x1xf32>
      %70 = arith.mulf %69, %47 : vector<8x1xf32>
      %71 = arith.addf %67, %70 : vector<8x1xf32>
      %cst_56 = arith.constant 3.906250e-03 : f32
      %72 = vector.broadcast %cst_56 : f32 to vector<8x1xf32>
      %73 = arith.mulf %71, %72 : vector<8x1xf32>
      %c0_57 = arith.constant 0 : index
      %c0_58 = arith.constant 0 : index
      %74 = vector.load %arg9[%c0_57, %c0_58] : memref<8x1xf32, #tpu.memory_space<vmem>>, vector<8x1xf32>
      %cst_59 = arith.constant 2.000000e+00 : f32
      %75 = vector.broadcast %cst_59 : f32 to vector<8x1xf32>
      %76 = arith.mulf %75, %49 : vector<8x1xf32>
      %77 = arith.mulf %76, %51 : vector<8x1xf32>
      %78 = arith.subf %74, %77 : vector<8x1xf32>
      %cst_60 = arith.constant 2.560000e+02 : f32
      %79 = vector.broadcast %cst_60 : f32 to vector<8x1xf32>
      %80 = arith.mulf %79, %49 : vector<8x1xf32>
      %81 = arith.mulf %80, %49 : vector<8x1xf32>
      %82 = arith.addf %78, %81 : vector<8x1xf32>
      %cst_61 = arith.constant 3.906250e-03 : f32
      %83 = vector.broadcast %cst_61 : f32 to vector<8x1xf32>
      %84 = arith.mulf %82, %83 : vector<8x1xf32>
      %cst_62 = arith.constant 0.000000e+00 : f32
      %85 = vector.broadcast %cst_62 : f32 to vector<8x1xf32>
      %86 = arith.maximumf %73, %85 : vector<8x1xf32>
      %87 = math.sqrt %86 : vector<8x1xf32>
      %cst_63 = arith.constant 0.000000e+00 : f32
      %88 = vector.broadcast %cst_63 : f32 to vector<8x1xf32>
      %89 = arith.maximumf %84, %88 : vector<8x1xf32>
      %90 = math.sqrt %89 : vector<8x1xf32>
      %91 = tpu.iota {dimensions = array<i32: 1>} : vector<8x128xi32>
      %c0_i32_64 = arith.constant 0 : i32
      %92 = vector.broadcast %c0_i32_64 : i32 to vector<8x128xi32>
      %93 = arith.cmpi eq, %91, %92 : vector<8x128xi32>
      %cst_65 = arith.constant 0.000000e+00 : f32
      %94 = vector.shape_cast %62 : vector<8x1xf32> to vector<8x1xf32>
      %95 = vector.broadcast %94 : vector<8x1xf32> to vector<8x128xf32>
      %96 = vector.broadcast %cst_65 : f32 to vector<8x128xf32>
      %97 = arith.select %93, %95, %96 : vector<8x128xi1>, vector<8x128xf32>
      %c1_i32 = arith.constant 1 : i32
      %98 = vector.broadcast %c1_i32 : i32 to vector<8x128xi32>
      %99 = arith.cmpi eq, %91, %98 : vector<8x128xi32>
      %cst_66 = arith.constant 0.000000e+00 : f32
      %100 = vector.shape_cast %87 : vector<8x1xf32> to vector<8x1xf32>
      %101 = vector.broadcast %100 : vector<8x1xf32> to vector<8x128xf32>
      %102 = vector.broadcast %cst_66 : f32 to vector<8x128xf32>
      %103 = arith.select %99, %101, %102 : vector<8x128xi1>, vector<8x128xf32>
      %104 = arith.addf %97, %103 : vector<8x128xf32>
      %c2_i32 = arith.constant 2 : i32
      %105 = vector.broadcast %c2_i32 : i32 to vector<8x128xi32>
      %106 = arith.cmpi eq, %91, %105 : vector<8x128xi32>
      %cst_67 = arith.constant 0.000000e+00 : f32
      %107 = vector.shape_cast %90 : vector<8x1xf32> to vector<8x1xf32>
      %108 = vector.broadcast %107 : vector<8x1xf32> to vector<8x128xf32>
      %109 = vector.broadcast %cst_67 : f32 to vector<8x128xf32>
      %110 = arith.select %106, %108, %109 : vector<8x128xi1>, vector<8x128xf32>
      %111 = arith.addf %104, %110 : vector<8x128xf32>
      %c0_68 = arith.constant 0 : index
      %c0_69 = arith.constant 0 : index
      %112 = vector.load %arg4[%c0_68, %c0_69] : memref<8x128xf32, #tpu.memory_space<vmem>>, vector<8x128xf32>
      tpu.vector_store %arg4[%c0_68, %c0_69], %111 {strides = array<i32>} : memref<8x128xf32, #tpu.memory_space<vmem>>, vector<8x128xf32>,
    } else {
    }
    return
  }
  func.func @transform_0(%arg0: i32, %arg1: i32) -> (i32, i32) {
    %c0_i32 = arith.constant 0 : i32
    return %arg0, %arg1 : i32, i32
  }
  func.func @transform_1(%arg0: i32, %arg1: i32) -> (i32, i32) {
    %c0_i32 = arith.constant 0 : i32
    return %arg0, %arg1 : i32, i32
  }
  func.func @transform_2(%arg0: i32, %arg1: i32) -> (i32, i32) {
    %c0_i32 = arith.constant 0 : i32
    %c0_i32_0 = arith.constant 0 : i32
    return %arg0, %c0_i32 : i32, i32
  }
}

</mosaic_0001>

<bundles_post_ra>
// kernel: squeeze.3
= control target key start
LH: loop header
LB: loop body
LE: loop exit
PB: predicated region body
PF: predicated region fallthrough
CT: control target
= control target key end

     0   :  { %vm7_vm0 = vcmask 31744   ;;  %s39_s0 = inlined_call_operand.vmem [shape: f32[8], index: 0, kind: input, shape index: {}]   ;;  %s40_s1 = inlined_call_operand.vmem [shape: f32[2,4], index: 1, kind: output, shape index: {}]  }
   0x1   :  { %v4_v0 = vld [vmem:[%s39_s0] sm:$0x1]  ;;  %s22_s0 = smov 124  }
   0x2   :  { %5 = vst [vmem:[#allocation1] sm:$0x1] %v4_v0 }
   0x9   :  { %v9_v1 = vld [vmem:[#allocation1] sm:$0x1]  }
   0xa   :  { %v6_v2 = vld [vmem:[#allocation1] sm:$0x1]   ;;  %10 = vrot.lane.b32.xlu0 %v9_v1, %s22_s0 }
   0xb   :  { %8 = vst.msk [vmem:[#allocation0] sm:$0x1] %vm7_vm0, %v6_v2  }
  0x7c   :  { %v11_v3 = vpop.permute.xlu0 %10  }
  0x7d   :  { %14 = vst.msk [vmem:[#allocation0 + $0x1] sm:$0x1] %vm7_vm0, %v11_v3  }
  0x84   :  { %v17_v4 = vld [vmem:[#allocation0] sm:$0x3] }
  0x85   :  { %20 = vst [vmem:[%s40_s1] sm:$0x3] %v17_v4 }

// kernel: l_bright_cosist.1
= control target key start
LH: loop header
LB: loop body
LE: loop exit
PB: predicated region body
PF: predicated region fallthrough
CT: control target
= control target key end

     0   :  { %vm15_vm0 = vcmask 7168   ;;  %v175_v2 = vmov inf   ;;  %v176_v18 = vmov 0.0   ;;  %v177_v19 = vmov 0   ;;  %s222_s0 = inlined_call_operand.vmem [shape: f32[8,256], index: 0, kind: input, shape index: {}]   ;;  %s223_s1 = inlined_call_operand.vmem [shape: f32[8,256], index: 1, kind: input, shape index: {}]   ;;  %s224_s2 = inlined_call_operand.vmem [shape: f32[8,128], index: 2, kind: output, shape index: {}]  }
   0x1   :  { %v23_v0 = vld [vmem:[%s222_s0] sm:$0xff]  ;;  %v24_v1 = vld [vmem:[%s222_s0 + $0x8] sm:$0xff]  ;;  %21 = vst.msk [vmem:[#allocation7] sm:$0xff] %vm15_vm0, %v175_v2  ;;  %168 = vset.pattern.permute.xlu1 %v177_v19  ;;  %169 = vset.pattern.permute.xlu2 %v177_v19 }
   0x2   :  { %v65_v3 = vmin.f32 %v23_v0, %v24_v1  ;;  %v28_v4 = vadd.f32 %v24_v1, %v23_v0  ;;  %v49_v5 = vmul.f32 %v23_v0, %v23_v0  ;;  %v50_v6 = vmul.f32 %v24_v1, %v24_v1  ;;  %22 = vst.msk [vmem:[#allocation8] sm:$0xff] %vm15_vm0, %v175_v2  ;;  %v25_v8 = vld [vmem:[%s223_s1] sm:$0xff]  ;;  %v26_v9 = vld [vmem:[%s223_s1 + $0x8] sm:$0xff] }
   0x3   :  { %v57_v10 = vmul.f32 %v25_v8, %v25_v8  ;;  %v58_v11 = vmul.f32 %v26_v9, %v26_v9  ;;  %v71_v12 = vmin.f32 %v25_v8, %v26_v9  ;;  %v35_v13 = vadd.f32 %v26_v9, %v25_v8  ;;  %16 = vst.msk [vmem:[#allocation2] sm:$0xff] %vm15_vm0, %v176_v18 }
   0x4   :  { %66 = vmin.xlane.f32.xlu0 %v65_v3  ;;  %29 = vadd.xlane.f32.xlu1 %v28_v4  ;;  %v51_v7 = vadd.f32 %v50_v6, %v49_v5  ;;  %v41_v15 = vmul.f32 %v25_v8, %v23_v0  ;;  %v42_v16 = vmul.f32 %v26_v9, %v24_v1 }
   0x5   :  { %v59_v14 = vadd.f32 %v58_v11, %v57_v10  ;;  %17 = vst.msk [vmem:[#allocation3] sm:$0xff] %vm15_vm0, %v176_v18  ;;  %170 = vset.pattern.permute.xlu0 %v177_v19 }
   0x6   :  { %52 = vadd.xlane.f32.xlu2 %v51_v7  ;;  %v43_v17 = vadd.f32 %v42_v16, %v41_v15  ;;  %18 = vst.msk [vmem:[#allocation4] sm:$0xff] %vm15_vm0, %v176_v18 }
   0x7   :  { %19 = vst.msk [vmem:[#allocation5] sm:$0xff] %vm15_vm0, %v176_v18 }
   0x8   :  { %20 = vst.msk [vmem:[#allocation6] sm:$0xff] %vm15_vm0, %v176_v18  ;;  %v64_v20 = vld [vmem:[#allocation7] sm:$0xff] }
   0x9   :  { %v70_v29 = vld [vmem:[#allocation8] sm:$0xff] }
   0xa   :  { %v27_v21 = vld [vmem:[#allocation2] sm:$0xff] }
   0xc   :  { %72 = vmin.xlane.f32.xlu0 %v71_v12  ;;  %36 = vadd.xlane.f32.xlu1 %v35_v13  ;;  %v34_v30 = vld [vmem:[#allocation3] sm:$0xff] }
   0xd   :  { %v40_v43 = vld [vmem:[#allocation4] sm:$0xff] }
   0xe   :  { %60 = vadd.xlane.f32.xlu2 %v59_v14  ;;  %v48_v24 = vld [vmem:[#allocation5] sm:$0xff] }
   0xf   :  { %v56_v33 = vld [vmem:[#allocation6] sm:$0xff] }
  0x14   :  { %44 = vadd.xlane.f32.xlu0 %v43_v17 }
  0x77   :  { %v67_v22 = vpop.xlane.xlu0 %66  ;;  %v30_v23 = vpop.xlane.xlu1 %29 }
  0x78   :  { %v68_v25 = vmin.f32 %v64_v20, %v67_v22  ;;  %v31_v26 = vadd.f32 %v30_v23, %v27_v21 }
  0x79   :  { %v53_v27 = vpop.xlane.xlu2 %52 }
  0x7a   :  { %69 = vst.msk [vmem:[#allocation7] sm:$0xff] %vm15_vm0, %v68_v25  ;;  %v54_v28 = vadd.f32 %v53_v27, %v48_v24 }
  0x7b   :  { %33 = vst.msk [vmem:[#allocation2] sm:$0xff] %vm15_vm0, %v31_v26 }
  0x7c   :  { %55 = vst.msk [vmem:[#allocation5] sm:$0xff] %vm15_vm0, %v54_v28 }
  0x7f   :  { %v73_v31 = vpop.xlane.xlu0 %72  ;;  %v37_v32 = vpop.xlane.xlu1 %36 }
  0x80   :  { %v74_v34 = vmin.f32 %v70_v29, %v73_v31  ;;  %v38_v35 = vadd.f32 %v37_v32, %v34_v30  ;;  %v135_v29 = vlaneseq }
  0x81   :  { %v61_v36 = vpop.xlane.xlu2 %60  ;;  %v79_v37 = vld [vmem:[#allocation7] sm:$0xff] }
  0x82   :  { %75 = vst.msk [vmem:[#allocation8] sm:$0xff] %vm15_vm0, %v74_v34  ;;  %v62_v38 = vadd.f32 %v61_v36, %v56_v33  ;;  %v80_v39 = vand.u32 2147483647, %v79_v37  ;;  %v83_v40 = vld [vmem:[#allocation2] sm:$0xff]  ;;  %v136_v30 = vand.u32 127, %v135_v29 }
  0x83   :  { %39 = vst.msk [vmem:[#allocation3] sm:$0xff] %vm15_vm0, %v38_v35  ;;  %v94_v44 = vld [vmem:[#allocation5] sm:$0xff] }
  0x84   :  { %63 = vst.msk [vmem:[#allocation6] sm:$0xff] %vm15_vm0, %v62_v38  ;;  %v90_v41 = vmul.f32 256.0, %v80_v39  ;;  %v95_v42 = vmul.f32 2.0, %v80_v39  ;;  %vm137_vm5 = vcmp.eq.s32.totalorder %v136_v30, 0  ;;  %vm144_vm6 = vcmp.eq.s32.totalorder %v136_v30, 1 }
  0x85   :  { %vm152_vm7 = vcmp.eq.s32.totalorder %v136_v30, 2 }
  0x86   :  { %v96_v45 = vmul.f32 %v95_v42, %v83_v40  ;;  %v98_v49 = vmul.f32 %v90_v41, %v80_v39 }
  0x87   :  { %v45_v46 = vpop.xlane.xlu0 %44 }
  0x88   :  { %v46_v47 = vadd.f32 %v45_v46, %v40_v43  ;;  %v97_v48 = vsub.f32 %v94_v44, %v96_v45 }
  0x89   :  { %v81_v50 = vld [vmem:[#allocation8] sm:$0xff] }
  0x8a   :  { %47 = vst.msk [vmem:[#allocation4] sm:$0xff] %vm15_vm0, %v46_v47  ;;  %v82_v51 = vand.u32 2147483647, %v81_v50  ;;  %v99_v52 = vadd.f32 %v98_v49, %v97_v48  ;;  %v84_v55 = vld [vmem:[#allocation3] sm:$0xff] }
  0x8b   :  { %v101_v56 = vld [vmem:[#allocation6] sm:$0xff]  ;;  %v88_v1 = vmul.f32 %v84_v55, %v80_v39 }
  0x8c   :  { %v100_v53 = vmul.f32 0.00390625, %v99_v52  ;;  %v102_v54 = vmul.f32 2.0, %v82_v51  ;;  %v105_v57 = vmul.f32 256.0, %v82_v51  ;;  %v86_v60 = vmul.f32 %v83_v40, %v82_v51 }
  0x8d   :  { %v91_v4 = vmul.f32 %v90_v41, %v82_v51 }
  0x8e   :  { %v103_v58 = vmul.f32 %v102_v54, %v84_v55  ;;  %v109_v59 = vmax.f32 %v100_v53, 0.0  ;;  %v106_v62 = vmul.f32 %v105_v57, %v82_v51 }
  0x90   :  { %v104_v61 = vsub.f32 %v101_v56, %v103_v58  ;;  %171 = vrsqrt.f32 %v109_v59  ;;  %vm117_vm1 = vcmp.eq.f32.partialorder %v109_v59, inf  ;;  %v120_v19 = vand.u32 2147483648, %v109_v59 }
  0x91   :  { %v85_v63 = vld [vmem:[#allocation4] sm:$0xff]  ;;  %vm119_vm2 = vcmp.eq.f32.partialorder %v109_v59, 0.0 }
  0x92   :  { %v87_v0 = vsub.f32 %v85_v63, %v86_v60  ;;  %v107_v2 = vadd.f32 %v106_v62, %v104_v61 }
  0x94   :  { %v89_v3 = vsub.f32 %v87_v0, %v88_v1  ;;  %v108_v5 = vmul.f32 0.00390625, %v107_v2 }
  0x96   :  { %v172_v6 = vpop.eup %171  ;;  %v92_v7 = vadd.f32 %v91_v4, %v89_v3  ;;  %v122_v8 = vmax.f32 %v108_v5, 0.0 }
  0x97   :  { %v111_v9 = vmul.f32 %v172_v6, %v109_v59 }
  0x98   :  { %v93_v10 = vmul.f32 0.00390625, %v92_v7  ;;  %173 = vrsqrt.f32 %v122_v8  ;;  %vm130_vm3 = vcmp.eq.f32.partialorder %v122_v8, inf  ;;  %v133_v26 = vand.u32 2147483648, %v122_v8 }
  0x99   :  { %v112_v11 = vmul.f32 %v172_v6, %v111_v9  ;;  %vm132_vm4 = vcmp.eq.f32.partialorder %v122_v8, 0.0 }
  0x9a   :  { %140 = vperm.xlu1 %168, %v93_v10  }
  0x9b   :  { %v113_v12 = vmul.f32 0.5, %v112_v11 }
  0x9d   :  { %v114_v13 = vsub.f32 1.5, %v113_v12 }
  0x9e   :  { %v174_v14 = vpop.eup %173 }
  0x9f   :  { %v115_v15 = vmul.f32 %v172_v6, %v114_v13  ;;  %v124_v16 = vmul.f32 %v174_v14, %v122_v8 }
  0xa1   :  { %v116_v17 = vmul.f32 %v115_v15, %v109_v59  ;;  %v125_v18 = vmul.f32 %v174_v14, %v124_v16 }
  0xa3   :  { %v118_v20 = vsel %vm117_vm1, %v109_v59, %v116_v17  ;;  %v126_v21 = vmul.f32 0.5, %v125_v18 }
  0xa4   :  { %v121_v22 = vsel %vm119_vm2, %v120_v19, %v118_v20 }
  0xa5   :  { %147 = vperm.xlu2 %169, %v121_v22   ;;  %v127_v23 = vsub.f32 1.5, %v126_v21 }
  0xa7   :  { %v128_v24 = vmul.f32 %v174_v14, %v127_v23 }
  0xa9   :  { %v129_v25 = vmul.f32 %v128_v24, %v122_v8 }
  0xab   :  { %v131_v27 = vsel %vm130_vm3, %v122_v8, %v129_v25 }
  0xac   :  { %v134_v28 = vsel %vm132_vm4, %v133_v26, %v131_v27 }
  0xad   :  { %155 = vperm.xlu0 %170, %v134_v28  }
  0xff   :  { %v148_v32 = vpop.permute.xlu2 %147 }
 0x100   :  { %v150_v34 = vsel %vm144_vm6, %v148_v32, 0.0 }
 0x10c   :  { %v141_v31 = vpop.permute.xlu1 %140 }
 0x10d   :  { %v143_v33 = vsel %vm137_vm5, %v141_v31, 0.0 }
 0x10e   :  { %v151_v35 = vadd.f32 %v150_v34, %v143_v33 }
 0x11f   :  { %v156_v36 = vpop.permute.xlu0 %155 }
 0x120   :  { %v158_v37 = vsel %vm152_vm7, %v156_v36, 0.0 }
 0x121   :  { %v159_v38 = vadd.f32 %v158_v37, %v151_v35 }
 0x123   :  { %160 = vst [vmem:[%s224_s2] sm:$0xff] %v159_v38 }

</bundles_post_ra>
